<compile_context>
chip_gen: v6e
topology: v6e:2x2x1
jax: 0.10.0
libtpu: 0.0.40
codegen_flags: <defaults>
</compile_context>

<pallas_src>
import jax
import jax.numpy as jnp
from jax.experimental import pallas as pl
from jax.experimental.pallas import tpu as pltpu

LANES = 128
_MIN_PALLAS_ELEMS = 256 * 1024  # ~1 MiB of f32; below this plain jnp wins


def _gaussian_kernel(neg_inv_ref, x_ref, o_ref):
    # neg_inv_ref: SMEM scalar = -1/(2*a^2); x_ref/o_ref: lane-dense VMEM tiles.
    neg_inv = neg_inv_ref[0]
    x = x_ref[...].astype(jnp.float32)
    o_ref[...] = jnp.exp((x * x) * neg_inv).astype(o_ref.dtype)


def _device_config():
    """Per-generation (target_block_bytes, min_grid_steps, vmem_limit_bytes)."""
    try:
        kind = jax.devices()[0].device_kind.lower()
    except Exception:
        kind = ""
    if "7" in kind:
        # v7x: 2 TCs, 3.2 TB/s HBM, 64 MiB physical VMEM (32 MiB scoped).
        return 6 * 1024 * 1024, 8, 32 * 1024 * 1024
    if "v6" in kind:
        # v6e: single TC; 2 arrays x 2 buffers x 4 MiB = 16 MiB < 32 MiB default.
        return 4 * 1024 * 1024, 2, None
    if "v5" in kind and ("lite" in kind or "v5e" in kind):
        # v5e: 16 MiB scoped default -> keep 2x2x3 MiB = 12 MiB under it.
        return 3 * 1024 * 1024, 2, None
    # Unknown / older generations: conservative.
    return 2 * 1024 * 1024, 2, None


def _choose_tile_rows(rows, itemsize, sublane, target_block_bytes, min_grid_steps):
    """Largest tile <= target_block_bytes, >= min_grid_steps steps, sublane-aligned."""
    max_tile_rows = max(
        sublane, (target_block_bytes // (LANES * itemsize)) // sublane * sublane
    )
    rows_per_step = -(-rows // min_grid_steps)
    tile_rows = min(max_tile_rows, rows_per_step)
    tile_rows = max(sublane, -(-tile_rows // sublane) * sublane)
    tile_rows = min(tile_rows, rows)  # rows is already a multiple of sublane
    return tile_rows


def gaussian_activation(x, a=1.0, *, min_pallas_elems=_MIN_PALLAS_ELEMS):
    """exp(-x**2 / (2*a**2)) elementwise via a Pallas TPU kernel.

    x: any-shape float array (e.g. NCHW activations).
    a: python float / scalar / shape-(1,) array (matches nn.Parameter((1,))).
    min_pallas_elems: route smaller tensors to the plain-jnp fast path.
    """
    orig_shape = x.shape
    orig_dtype = x.dtype
    n = x.size

    a_scalar = jnp.asarray(a, dtype=jnp.float32).reshape(())
    # Fold the negate into the precomputed scalar (free VALU filler removal).
    neg_inv = jnp.reshape(-1.0 / (2.0 * a_scalar * a_scalar), (1,))

    def _jnp_gauss(v):
        v32 = v.astype(jnp.float32)
        return jnp.exp((v32 * v32) * neg_inv[0]).astype(orig_dtype)

    itemsize = jnp.dtype(orig_dtype).itemsize
    # Packed-sublane multiple: 8 rows for f32, 16 for bf16/f16, 32 for int8/fp8.
    sublane = 8 * max(1, 4 // itemsize)
    align = sublane * LANES  # kernel-prefix alignment, in elements

    # Fast path: small tensors (or anything smaller than one aligned row-group).
    if n < max(min_pallas_elems, align):
        return _jnp_gauss(x)

    flat = x.reshape(-1)
    prefix_n = (n // align) * align          # sublane*128-aligned prefix
    tail_n = n - prefix_n                    # < sublane*128 elements, jnp-handled

    rows = prefix_n // LANES                 # multiple of `sublane` by construction
    x2d = flat[:prefix_n].reshape(rows, LANES)

    target_block_bytes, min_grid_steps, vmem_limit = _device_config()
    tile_rows = _choose_tile_rows(rows, itemsize, sublane,
                                  target_block_bytes, min_grid_steps)
    grid = (pl.cdiv(rows, tile_rows),)

    out2d = pl.pallas_call(
        _gaussian_kernel,
        out_shape=jax.ShapeDtypeStruct((rows, LANES), orig_dtype),
        grid=grid,
        in_specs=[
            pl.BlockSpec(memory_space=pltpu.SMEM),               # scalar -1/(2a^2)
            pl.BlockSpec((tile_rows, LANES), lambda i: (i, 0)),  # input tile
        ],
        out_specs=pl.BlockSpec((tile_rows, LANES), lambda i: (i, 0)),
        compiler_params=pltpu.CompilerParams(
            dimension_semantics=("parallel",),
            vmem_limit_bytes=vmem_limit,
        ),
        cost_estimate=pl.CostEstimate(
            flops=2 * prefix_n,
            transcendentals=prefix_n,
            bytes_accessed=2 * prefix_n * itemsize,
        ),
    )(neg_inv, x2d)

    out_flat = out2d.reshape(-1)
    if tail_n:
        out_flat = jnp.concatenate([out_flat, _jnp_gauss(flat[prefix_n:])])
    return out_flat.reshape(orig_shape)


if __name__ == "__main__":
    key = jax.random.PRNGKey(0)
    a = 1.0

    # f32 NCHW activation (module-spec shape). Force the Pallas path — with the
    # production threshold this small tensor would take the jnp fast path.
    x = jax.random.normal(key, (2, 4, 16, 16), dtype=jnp.float32)
    y = jax.block_until_ready(gaussian_activation(x, a=a, min_pallas_elems=0))
    y_ref = jnp.exp(-(x ** 2) / (2.0 * a ** 2))
    assert y.shape == x.shape and y.dtype == x.dtype
    assert jnp.allclose(y, y_ref, atol=1e-6, rtol=1e-6)

    # bf16 input (Pallas path, 16-row packed-sublane tiles, f32 compute).
    xb = x.astype(jnp.bfloat16)
    yb = jax.block_until_ready(gaussian_activation(xb, a=a, min_pallas_elems=0))
    yb_ref = jnp.exp(-(xb.astype(jnp.float32) ** 2) / (2.0 * a ** 2)).astype(jnp.bfloat16)
    assert yb.shape == xb.shape and yb.dtype == xb.dtype
    assert jnp.allclose(yb.astype(jnp.float32), yb_ref.astype(jnp.float32),
                        atol=1e-2, rtol=1e-2)

    # Ragged size: 7*13*33 = 3003 elems -> 2048-elem kernel prefix + jnp tail.
    xr = jax.random.normal(jax.random.PRNGKey(1), (7, 13, 33), dtype=jnp.float32)
    yr = jax.block_until_ready(gaussian_activation(xr, a=a, min_pallas_elems=0))
    yr_ref = jnp.exp(-(xr ** 2) / (2.0 * a ** 2))
    assert yr.shape == xr.shape and jnp.allclose(yr, yr_ref, atol=1e-6, rtol=1e-6)

    # Default threshold -> jnp fast path for tiny tensors (same semantics).
    xs = jax.random.normal(jax.random.PRNGKey(2), (3, 5, 7), dtype=jnp.float32)
    ys = jax.block_until_ready(gaussian_activation(xs, a=a))
    ys_ref = jnp.exp(-(xs ** 2) / (2.0 * a ** 2))
    assert ys.shape == xs.shape and jnp.allclose(ys, ys_ref, atol=1e-6, rtol=1e-6)

    print("KERNEL_OK")
</pallas_src>

<mosaic_0001>
module attributes {stable_mosaic.version = 11 : i64} {
  func.func @_gaussian_kernel(%arg0: i32, %arg1: memref<1xf32, #tpu.memory_space<smem>>, %arg2: memref<8x128xf32, #tpu.memory_space<vmem>>, %arg3: memref<8x128xf32, #tpu.memory_space<vmem>>) attributes {dimension_semantics = [#tpu.dimension_semantics<parallel>], iteration_bounds = array<i64: 2>, scalar_prefetch = 0 : i64, scratch_operands = 0 : i64, tpu.core_type = #tpu.core_type<tc>, window_params = [{transform_indices = @transform_0, window_bounds = array<i64: 1>}, {transform_indices = @transform_1, window_bounds = array<i64: 8, 128>}, {transform_indices = @transform_2, window_bounds = array<i64: 8, 128>}]} {
    %c0 = arith.constant 0 : index
    %0 = memref.load %arg1[%c0] : memref<1xf32, #tpu.memory_space<smem>>
    %c0_0 = arith.constant 0 : index
    %c0_1 = arith.constant 0 : index
    %1 = vector.load %arg2[%c0_0, %c0_1] : memref<8x128xf32, #tpu.memory_space<vmem>>, vector<8x128xf32>
    %2 = arith.mulf %1, %1 : vector<8x128xf32>
    %3 = vector.broadcast %0 : f32 to vector<8x128xf32>
    %4 = arith.mulf %2, %3 : vector<8x128xf32>
    %5 = math.exp %4 : vector<8x128xf32>
    %c0_2 = arith.constant 0 : index
    %c0_3 = arith.constant 0 : index
    %6 = vector.load %arg3[%c0_2, %c0_3] : memref<8x128xf32, #tpu.memory_space<vmem>>, vector<8x128xf32>
    tpu.vector_store %arg3[%c0_2, %c0_3], %5 {strides = array<i32>} : memref<8x128xf32, #tpu.memory_space<vmem>>, vector<8x128xf32>,
    return
  }
  func.func @transform_0(%arg0: i32) -> i32 {
    %c0_i32 = arith.constant 0 : i32
    %c0_i32_0 = arith.constant 0 : i32
    return %c0_i32 : i32
  }
  func.func @transform_1(%arg0: i32) -> (i32, i32) {
    %c0_i32 = arith.constant 0 : i32
    %c0_i32_0 = arith.constant 0 : i32
    return %arg0, %c0_i32 : i32, i32
  }
  func.func @transform_2(%arg0: i32) -> (i32, i32) {
    %c0_i32 = arith.constant 0 : i32
    %c0_i32_0 = arith.constant 0 : i32
    return %arg0, %c0_i32 : i32, i32
  }
}

</mosaic_0001>

<bundles_post_ra>
// kernel: tpu_custom_call.1
= control target key start
LH: loop header
LB: loop body
LE: loop exit
PB: predicated region body
PF: predicated region fallthrough
CT: control target
= control target key end

     0   :  { %s573_s0 = inlined_call_operand.<no memory space> [shape: f32[1], index: 0, kind: input, shape index: {}]   ;;  %s574_s1 = inlined_call_operand.hbm [shape: f32[16,128], index: 1, kind: input, shape index: {}]   ;;  %s575_s2 = inlined_call_operand.hbm [shape: f32[16,128], index: 2, kind: output, shape index: {}]  }
   0x1   :  { %7 = sst [smem:[#allocation2]] %s573_s0 }
   0x2   :  { %8 = vsyncpa [#allocation4], 0 }
   0x3   :  { %10 = vsyncpa [#allocation4 + $0x1], 0 }
   0x4   :  { %11 = vsyncpa [#allocation5], 0 }
   0x5   :  { %13 = vsyncpa [#allocation5 + $0x1], 0  ;;  %s426_s11 = smov 0   ;;  %s428_s12 = smov 0  }
   0x6   :  { %s430_s13 = smov 0   ;;  %s432_s14 = smov 0  }
   0x7 LB: > { %s447_s0 = sadd.s32 4294967295, %s404_s14   ;;  %s252_s15 = sadd.s32 4294967294, %s404_s14   ;;  %s404_s14 = sphi %s432_s14, %s592_s14   ;;  %s400_s13 = sphi %s430_s13, %s591_s13   ;;  %s396_s12 = sphi %s428_s12, %s590_s12   ;;  %s392_s11 = sphi %s426_s11, %s589_s11  }
   0x8   : > { %s451_s16 = sadd.s32 1, %s404_s14   ;;  %s47_s17 = sadd.s32 1, %s400_s13 }
   0x9   : > { %s44_s18 = ssub.s32 %s404_s14, %s451_s16  ;;  %p54_p0 = scmp.ne.s32.totalorder %s400_s13, %s396_s12 }
   0xa   : > { %p45_p1 = scmp.eq.s32.totalorder %s44_s18, 0  ;;  %p55_p2 = scmp.eq.s32.totalorder %s404_s14, 0 }
   0xb   : > { %p60_p3 = scmp.ne.s32.totalorder %s396_s12, %s392_s11  ;;  %p61_p4 = scmp.eq.s32.totalorder %s447_s0, 0 }
   0xc   : > { %s463_s19 = scalar_select %p45_p1, %s400_s13, %s47_s17  }
   0xd   : > { %p465_p5 = por %p55_p2, %p54_p0  ;;  %p469_p6 = por %p61_p4, %p60_p3 }
   0xe   : > { %p84_p7 = scmp.eq.s32.totalorder %s447_s0, 1  ;;  %p90_p8 = scmp.eq.s32.totalorder %s252_s15, 1 }
   0xf   : > { %s579_s21 = scalar_select %p469_p6, 1, 0 }
  0x10   : > { %p276_p10 = scmp.lt.s32.totalorder %s404_s14, 2  ;;  %p476_p11 = por %p84_p7, %p54_p0 }
  0x11   : > { %p480_p12 = por %p90_p8, %p60_p3  ;;  %s113_s24 = sand.u32 1, %s400_s13  }
  0x12   : > { %s580_s22 = scalar_select %p476_p11, 1, 0 }
  0x13   : > { %s581_s23 = scalar_select %p480_p12, 1, 0 }
  0x14   : > { %s256_s25 = sshll.u32 %s404_s14, 7  ;;  %s255_s26 = sshll.u32 %s113_s24, 3 }
  0x15   : > { %s489_s29 = scalar_lea.hbm %s574_s1, %s256_s25  ;;  %s117_s30 = scalar_lea.vmem [#allocation3], %s255_s26 }
  0x16   : > { %s124_s3 = sshll.u32 %s117_s30, 4  ;;  %p493_p13 = pnand %p276_p10, %p465_p5  ;;  %s497_s3 = int_to_ptr.vmem [resolvable:$true] %s124_s3 }
  0x17   : > { %s114_s5 = scalar_lea.sflag [#allocation4], %s113_s24  ;;  %s312_s6 = scalar_lea.hbm %s489_s29, 128 }
  0x18   : > { %p313_p2 = scmp.ne.s32.totalorder %s489_s29, %s312_s6  ;;  %p314_p3 = pneg %p493_p13 }
  0x19   : > { %s317_s9 = scalar_lea.hbm %s574_s1, 256  ;;  %p318_p5 = scmp.lt.s32.totalorder %s489_s29, %s574_s1 }
  0x1a   : > { %p315_p4 = pnand %p314_p3, %p313_p2  ;;  %p319_p8 = scmp.lt.s32.totalorder %s317_s9, %s312_s6 }
  0x1c   : > { %p316_p7 = pneg %p315_p4  ;;  %p320_p10 = por %p319_p8, %p318_p5 }
  0x1e   : > { %p321_p9 = pnand %p320_p10, %p316_p7 }
  0x20   : > { %324 = shalt.err (!%p321_p9)
}
  0x21   : > { %s325_s17 = scalar_lea.vmem %s497_s3, 128  ;;  %s406_s18 = smov [#allocation3]  }
  0x22   : > { %p326_p0 = scmp.ne.s32.totalorder %s497_s3, %s325_s17  ;;  %s330_s20 = sshll.u32 %s406_s18, 4  ;;  %s331_s20 = int_to_ptr.vmem [resolvable:$false] %s330_s20 }
  0x23   : > { %s332_s24 = scalar_lea.vmem %s331_s20, 256  ;;  %p333_p4 = scmp.lt.s32.totalorder %s497_s3, %s331_s20 }
  0x24   : > { %p328_p1 = pnand %p326_p0, %p314_p3  ;;  %p334_p12 = scmp.lt.s32.totalorder %s332_s24, %s325_s17 }
  0x26   : > { %p329_p2 = pneg %p328_p1  ;;  %p335_p11 = por %p334_p12, %p333_p4 }
  0x28   : > { %p336_p6 = pnand %p335_p11, %p329_p2 }
  0x2a   : > { %339 = shalt.err (!%p336_p6)
}
  0x2b   : > { %271 = dma.hbm_to_vmem [thread:$0]  (!%p493_p13), %s489_s29, 128, %s497_s3, %s114_s5  }
  0x2c   : > { %p583_p9 = scmp.lt.s32.totalorder %s404_s14, 3  ;;  %p584_p7 = scmp.ge.s32.totalorder %s404_s14, 1 }
  0x2e   : > { %p130_p0 = pnand %p584_p7, %p583_p9 }
  0x2f   : > { %s524_s25 = sand.u32 (!%p130_p0), 1, %s396_s12   ;;  %p585_p6 = scmp.ne.s32.totalorder (!%p130_p0), %s579_s21, 0 }
  0x30   : > { %133 = sbr.rel (%p130_p0) target bundleno = 92 (0x5c), region = 28  ;;  %s258_s26 = sshll.u32 (!%p130_p0), %s524_s25, 3 }
  0x31   : > { %s136_s27 = scalar_lea.sflag (!%p130_p0), [#allocation4], %s524_s25  ;;  %s139_s28 = scalar_lea.vmem (!%p130_p0), [#allocation3], %s258_s26 }
  0x35   : > { %383 = dma.done.wait (%p585_p6), %s136_s27, 128  }
  0x36   : > { %385 = vsyncadd (%p585_p6), %s136_s27, 4294967168  ;;  %s160_s29 = sld [smem:[#allocation2]]  ;;  %v161_v0 = vld [vmem:[%s139_s28] sm:$0xff]  ;;  %s159_s30 = scalar_lea.vmem [#allocation6], %s258_s26 }
  0x37   : > { %v162_v2 = vmul.f32 %v161_v0, %v161_v0  ;;  %s182_s3 = sshll.u32 %s159_s30, 4  ;;  %s261_s4 = sshll.u32 %s447_s0, 7  ;;  %s533_s3 = int_to_ptr.vmem [resolvable:$true] %s182_s3 }
  0x38   : > { %s180_s21 = scalar_lea.hbm %s575_s2, %s261_s4  ;;  %s169_s7 = scalar_lea.sflag [#allocation5], %s524_s25 }
  0x39   : > { %s340_s8 = scalar_lea.vmem %s533_s3, 128  ;;  %p586_p12 = scmp.ne.s32.totalorder %s580_s22, 0 }
  0x3a   : > { %p341_p11 = scmp.ne.s32.totalorder %s533_s3, %s340_s8  ;;  %s407_s9 = smov [#allocation6]  }
  0x3b   : > { %s344_s10 = sshll.u32 %s407_s9, 4  ;;  %s345_s10 = int_to_ptr.vmem [resolvable:$false] %s344_s10 }
  0x3c   : > { %v163_v1 = vstv %s160_s29  ;;  %p342_p13 = pnand %p341_p11, %p586_p12  ;;  %s346_s0 = scalar_lea.vmem %s345_s10, 256 }
  0x3d   : > { %v164_v3 = vmul.f32 %v163_v1, %v162_v2  ;;  %p347_p3 = scmp.lt.s32.totalorder %s533_s3, %s345_s10  ;;  %p348_p5 = scmp.lt.s32.totalorder %s346_s0, %s340_s8 }
  0x3e   : > { %p343_p1 = pneg %p342_p13 }
  0x3f   : > { %v165_v4 = vmul.f32 1.442695, %v164_v3  ;;  %p349_p8 = por %p348_p5, %p347_p3 }
  0x41   : > { %310 = vpow2.f32 %v165_v4  ;;  %p350_p10 = pnand %p349_p8, %p343_p1 }
  0x4e   : > { %v311_v5 = vpop.eup %310 }
  0x4f   : > { %167 = vst [vmem:[%s159_s30] sm:$0xff] %v311_v5 }
  0x50   : > { %353 = shalt.err (!%p350_p10)
}
  0x51   : > { %s354_s15 = scalar_lea.hbm %s180_s21, 128  ;;  %s358_s20 = scalar_lea.hbm %s575_s2, 256 }
  0x52   : > { %p355_p2 = scmp.ne.s32.totalorder %s180_s21, %s354_s15  ;;  %p359_p7 = scmp.lt.s32.totalorder %s180_s21, %s575_s2 }
  0x53   : > { %p360_p0 = scmp.lt.s32.totalorder %s358_s20, %s354_s15 }
  0x54   : > { %p356_p4 = pnand %p355_p2, %p586_p12 }
  0x55   : > { %p361_p6 = por %p360_p0, %p359_p7 }
  0x56   : > { %p357_p9 = pneg %p356_p4 }
  0x58   : > { %p362_p11 = pnand %p361_p6, %p357_p9 }
  0x5a   : > { %365 = shalt.err (!%p362_p11)
}
  0x5b   : > { %266 = dma.vmem_to_hbm [thread:$0]  (%p586_p12), %s533_s3, 128, %s180_s21, %s169_s7  }
  0x5c PF: > { %s194_s26 = sand.u32 1, %s392_s11   ;;  %p587_p13 = scmp.ne.s32.totalorder %s581_s23, 0 }
  0x5d   : > { %p588_p1 = scmp.ge.s32.totalorder %s404_s14, 2  ;;  %s195_s27 = scalar_lea.sflag [#allocation5], %s194_s26 }
  0x5f   : > { %p273_p3 = pnand %p588_p1, %p587_p13 }
  0x61   : > { %p274_p5 = pneg %p273_p3 }
  0x63   : > { %387 = dma.done.wait (%p274_p5), %s195_s27, 128  }
  0x64   : > { %389 = vsyncadd (%p274_p5), %s195_s27, 4294967168  ;;  %p16_p8 = scmp.ge.s32.totalorder %s451_s16, 4   ;;  %s589_s11 = smov %s396_s12 }
  0x65   : > { %s590_s12 = smov %s400_s13  ;;  %s591_s13 = smov %s463_s19 }
  0x66   : > { %s592_s14 = smov %s451_s16  ;;  %18 = sbr.rel (!%p16_p8) target bundleno = 7 (0x7), region = 73 }
  0x6b   :  { %200 = vsyncpa [#allocation4], 1 }
  0x6c   :  { %202 = vsyncpa [#allocation4 + $0x1], 1 }
  0x6d   :  { %203 = vsyncpa [#allocation5], 1 }
  0x6e   :  { %205 = vsyncpa [#allocation5 + $0x1], 1 }

</bundles_post_ra>
